<compile_context>
chip_gen: v5e
topology: v5e:2x2
jax: 0.10.0
libtpu: 0.0.40
codegen_flags: <defaults>
</compile_context>

<pallas_src>
import jax
import jax.numpy as jnp
from jax.experimental import pallas as pl
from jax.experimental.pallas import tpu as pltpu


_LANE = 128
_SMALL_BYTES = 1 * 1024 * 1024   # single full-block fast path threshold
_MAX_ROW_BLOCK = 2048            # 2048 x 128 x 4B = 1 MiB f32 tile


def _copy_kernel(x_ref, o_ref):
    # Whole-tile copy (pure load/store path).
    o_ref[...] = x_ref[...]


def _sublane(dtype) -> int:
    # dtype-dependent minimum sublane packing: f32 -> 8, bf16 -> 16, int8/fp8 -> 32.
    return {4: 8, 2: 16, 1: 32}.get(jnp.dtype(dtype).itemsize, 8)


def _round_up(n: int, m: int) -> int:
    return ((n + m - 1) // m) * m


def _copy_single_block(x: jax.Array) -> jax.Array:
    """Small arrays: one full-array block, no grid, no reshape, no padding."""
    total_bytes = int(x.size) * jnp.dtype(x.dtype).itemsize
    return pl.pallas_call(
        _copy_kernel,
        out_shape=jax.ShapeDtypeStruct(x.shape, x.dtype),
        cost_estimate=pl.CostEstimate(
            flops=0, transcendentals=0, bytes_accessed=2 * total_bytes
        ),
    )(x)


def _copy_tiled_2d(x2d: jax.Array) -> jax.Array:
    """Large lane-dense (rows, 128) arrays: big row-block tiles, ragged tail OK."""
    rows, lane = x2d.shape
    dtype = x2d.dtype
    itemsize = jnp.dtype(dtype).itemsize
    total_bytes = rows * lane * itemsize

    sub = _sublane(dtype)
    row_block = min(_MAX_ROW_BLOCK, _round_up(rows, sub))
    grid = (pl.cdiv(rows, row_block),)

    return pl.pallas_call(
        _copy_kernel,
        out_shape=jax.ShapeDtypeStruct((rows, lane), dtype),
        grid_spec=pltpu.PrefetchScalarGridSpec(
            num_scalar_prefetch=0,
            grid=grid,
            in_specs=[pl.BlockSpec((row_block, lane), lambda i: (i, 0))],
            out_specs=pl.BlockSpec((row_block, lane), lambda i: (i, 0)),
        ),
        compiler_params=pltpu.CompilerParams(
            dimension_semantics=("parallel",),
        ),
        cost_estimate=pl.CostEstimate(
            flops=0, transcendentals=0, bytes_accessed=2 * total_bytes
        ),
    )(x2d)


def yolov4_forward(x: jax.Array) -> jax.Array:
    """Pallas implementation of Yolov4.forward (identity)."""
    orig_shape = x.shape
    dtype = x.dtype
    total = int(x.size)
    if total == 0:
        return x

    itemsize = jnp.dtype(dtype).itemsize
    total_bytes = total * itemsize

    # Fast path 1: small arrays — one full-array VMEM block.
    if total_bytes <= _SMALL_BYTES:
        return _copy_single_block(x)

    # Fast path 2: large arrays whose element count is a multiple of 128 —
    # lane-dense (rows, 128) view, large tiles, no padding and no slicing.
    if total % _LANE == 0:
        rows = total // _LANE
        out2d = _copy_tiled_2d(x.reshape(rows, _LANE))
        return out2d.reshape(orig_shape)

    # TODO(synk): rare large-and-ragged case (element count not a multiple of
    # 128): pad/truncate keeps correctness at the cost of an extra HBM pass.
    pad = _round_up(total, _LANE) - total
    x_flat = jnp.concatenate([x.reshape(-1), jnp.zeros((pad,), dtype=dtype)])
    out_flat = _copy_tiled_2d(x_flat.reshape(-1, _LANE)).reshape(-1)[:total]
    return out_flat.reshape(orig_shape)


if __name__ == "__main__":
    key = jax.random.PRNGKey(0)

    # Small NCHW input consistent with Yolov4's first conv (3 input channels).
    x_small = jax.random.normal(key, (2, 3, 16, 16), dtype=jnp.float32)
    y_small = jax.block_until_ready(yolov4_forward(x_small))
    assert y_small.shape == x_small.shape and y_small.dtype == x_small.dtype
    assert bool(jnp.array_equal(y_small, x_small))

    # Also exercise the tiled large-block path (still modest: ~1.5 MiB f32).
    x_big = jax.random.normal(
        jax.random.PRNGKey(1), (2, 3, 256, 256), dtype=jnp.float32
    )
    y_big = jax.block_until_ready(yolov4_forward(x_big))
    assert y_big.shape == x_big.shape and y_big.dtype == x_big.dtype
    assert bool(jnp.array_equal(y_big, x_big))

    print("KERNEL_OK")
</pallas_src>

<mosaic_0001>
module attributes {stable_mosaic.version = 11 : i64} {
  func.func @_copy_kernel(%arg0: memref<2x3x16x16xf32, #tpu.memory_space<vmem>>, %arg1: memref<2x3x16x16xf32, #tpu.memory_space<vmem>>) attributes {dimension_semantics = [], scalar_prefetch = 0 : i64, scratch_operands = 0 : i64, tpu.core_type = #tpu.core_type<tc>} {
    %c0 = arith.constant 0 : index
    %c0_0 = arith.constant 0 : index
    %c0_1 = arith.constant 0 : index
    %c0_2 = arith.constant 0 : index
    %0 = vector.load %arg0[%c0, %c0_0, %c0_1, %c0_2] : memref<2x3x16x16xf32, #tpu.memory_space<vmem>>, vector<2x3x16x16xf32>
    %c0_3 = arith.constant 0 : index
    %c0_4 = arith.constant 0 : index
    %c0_5 = arith.constant 0 : index
    %c0_6 = arith.constant 0 : index
    %1 = vector.load %arg1[%c0_3, %c0_4, %c0_5, %c0_6] : memref<2x3x16x16xf32, #tpu.memory_space<vmem>>, vector<2x3x16x16xf32>
    tpu.vector_store %arg1[%c0_3, %c0_4, %c0_5, %c0_6], %0 {strides = array<i32>} : memref<2x3x16x16xf32, #tpu.memory_space<vmem>>, vector<2x3x16x16xf32>,
    return
  }
}

</mosaic_0001>

<bundles_post_ra>
// kernel: tpu_custom_call.1
= control target key start
LH: loop header
LB: loop body
LE: loop exit
PB: predicated region body
PF: predicated region fallthrough
CT: control target
= control target key end

     0   :  { %6 = vsyncpa [#allocation3], 0  ;;  %s163_s0 = inlined_call_operand.hbm [shape: f32[2,3,16,16], index: 0, kind: input, shape index: {}]   ;;  %s164_s1 = inlined_call_operand.hbm [shape: f32[2,3,16,16], index: 1, kind: output, shape index: {}]  }
   0x1   :  { %7 = vsyncpa [#allocation4], 0  ;;  %s12_s8 = sshll.u32 %s163_s0, 4  ;;  %s125_s9 = smov [#allocation2]   ;;  %s13_s8 = int_to_ptr.hbm [resolvable:$true] %s12_s8 }
   0x2   :  { %s14_s10 = sshll.u32 %s125_s9, 4  ;;  %s126_s11 = smov 128   ;;  %s15_s10 = int_to_ptr.vmem [resolvable:$true] %s14_s10 }
   0x3   :  { %s127_s12 = smov 8  }
   0x4   :  { %20 = dma.hbm_to_vmem [thread:$0]  %s13_s8, 1536, %s15_s10, [#allocation3], %s126_s11, %s126_s11, %s127_s12  }
   0x5   :  { %121 = dma.done.wait [#allocation3], 1536  }
   0x6   :  { %122 = vsyncadd [#allocation3], 4294965760  ;;  %vm37_vm0 = vcmask 130048   ;;  %v25_v0 = vld [vmem:[#allocation2] sm:$0xff]  ;;  %v26_v1 = vld [vmem:[#allocation2 + $0x8] sm:$0xff]  ;;  %s128_s0 = smov [#allocation5]  }
   0x7   :  { %v27_v2 = vld [vmem:[#allocation2 + $0x10] sm:$0xff]  ;;  %38 = vst.msk [vmem:[#allocation5] sm:$0xff] %vm37_vm0, %v25_v0  ;;  %v28_v3 = vld [vmem:[#allocation2 + $0x18] sm:$0xff]  ;;  %v29_v4 = vld [vmem:[#allocation2 + $0x20] sm:$0xff]  ;;  %s54_s13 = sshll.u32 %s128_s0, 4  ;;  %s56_s16 = sshll.u32 %s164_s1, 4  ;;  %s55_s13 = int_to_ptr.vmem [resolvable:$true] %s54_s13  ;;  %s57_s16 = int_to_ptr.hbm [resolvable:$true] %s56_s16 }
   0x8   :  { %39 = vst.msk [vmem:[#allocation5 + $0x8] sm:$0xff] %vm37_vm0, %v26_v1  ;;  %v30_v5 = vld [vmem:[#allocation2 + $0x28] sm:$0xff]  ;;  %v31_v6 = vld [vmem:[#allocation2 + $0x30] sm:$0xff]  ;;  %v32_v7 = vld [vmem:[#allocation2 + $0x38] sm:$0xff] }
   0x9   :  { %40 = vst.msk [vmem:[#allocation5 + $0x10] sm:$0xff] %vm37_vm0, %v27_v2  ;;  %v33_v8 = vld [vmem:[#allocation2 + $0x40] sm:$0xff]  ;;  %v34_v9 = vld [vmem:[#allocation2 + $0x48] sm:$0xff]  ;;  %v35_v10 = vld [vmem:[#allocation2 + $0x50] sm:$0xff] }
   0xa   :  { %41 = vst.msk [vmem:[#allocation5 + $0x18] sm:$0xff] %vm37_vm0, %v28_v3  ;;  %v36_v11 = vld [vmem:[#allocation2 + $0x58] sm:$0xff] }
   0xb   :  { %42 = vst.msk [vmem:[#allocation5 + $0x20] sm:$0xff] %vm37_vm0, %v29_v4 }
   0xc   :  { %43 = vst.msk [vmem:[#allocation5 + $0x28] sm:$0xff] %vm37_vm0, %v30_v5 }
   0xd   :  { %44 = vst.msk [vmem:[#allocation5 + $0x30] sm:$0xff] %vm37_vm0, %v31_v6 }
   0xe   :  { %45 = vst.msk [vmem:[#allocation5 + $0x38] sm:$0xff] %vm37_vm0, %v32_v7 }
   0xf   :  { %46 = vst.msk [vmem:[#allocation5 + $0x40] sm:$0xff] %vm37_vm0, %v33_v8 }
  0x10   :  { %47 = vst.msk [vmem:[#allocation5 + $0x48] sm:$0xff] %vm37_vm0, %v34_v9 }
  0x11   :  { %48 = vst.msk [vmem:[#allocation5 + $0x50] sm:$0xff] %vm37_vm0, %v35_v10 }
  0x12   :  { %49 = vst.msk [vmem:[#allocation5 + $0x58] sm:$0xff] %vm37_vm0, %v36_v11 }
  0x13   :  { %62 = dma.vmem_to_hbm [thread:$0]  %s55_s13, 1536, %s57_s16, [#allocation4], %s126_s11, %s126_s11, %s127_s12  }
  0x14   :  { %123 = dma.done.wait [#allocation4], 1536  }
  0x15   :  { %124 = vsyncadd [#allocation4], 4294965760 }
  0x16   :  { %67 = vsyncpa [#allocation3], 1 }
  0x17   :  { %68 = vsyncpa [#allocation4], 1 }

</bundles_post_ra>
